<compile_context>
chip_gen: v6e
topology: v6e:2x2x1
jax: 0.10.0
libtpu: 0.0.40
codegen_flags: <defaults>
</compile_context>

<pallas_src>
import functools

import jax
import jax.numpy as jnp
from jax.experimental import pallas as pl
from jax.experimental.pallas import tpu as pltpu


def _round_up(x, m):
    return ((x + m - 1) // m) * m


def _dismult_kernel(s_ref, w_ref, o_ref, out_ref, acc_ref, *, tf, feat, ragged):
    """One (tb, tf) tile of sum(s * w * o, axis=1).

    Grid = (row tiles, feature tiles); the feature (reduction) axis is innermost.
    acc_ref holds lane-wise (tb, 128) f32 partial sums, resident across k.
    """
    k = pl.program_id(1)

    @pl.when(k == 0)
    def _():
        acc_ref[...] = jnp.zeros_like(acc_ref)

    acc = acc_ref[...]
    # 128-column chunks: bounded f32 temporaries (tb x 128 per operand), pure VPU.
    for g in range(tf // 128):
        c0 = g * 128                                            # static, vreg-aligned
        s_c = s_ref[:, pl.ds(c0, 128)].astype(jnp.float32)      # (tb, 128)
        o_c = o_ref[:, pl.ds(c0, 128)].astype(jnp.float32)      # (tb, 128)
        w_c = w_ref[:, pl.ds(c0, 128)].astype(jnp.float32)      # (1, 128) broadcasts
        prod = s_c * w_c * o_c
        if ragged:
            # Unpadded input: columns >= feat in the last feature block are
            # garbage (possibly NaN) -> mask them out before accumulating.
            cols = k * tf + c0 + jax.lax.broadcasted_iota(jnp.int32, prod.shape, 1)
            prod = jnp.where(cols < feat, prod, 0.0)
        acc = acc + prod
    acc_ref[...] = acc                                          # one store per k step

    # Single cross-lane (XLU) reduction, deferred to the last feature step.
    @pl.when(k == pl.num_programs(1) - 1)
    def _():
        out_ref[...] = jnp.sum(acc_ref[...], axis=1, keepdims=True).astype(out_ref.dtype)


def single_relation_dismult(s, weights, o, *, tb=None, tf=None):
    """Pallas implementation of SingleRelationDismult.forward.

    s, o:     (B, F)   (float32 or bfloat16; accumulation is always f32)
    weights:  (1, F) or (F,)
    returns:  (B,) float32
    """
    B, F = s.shape
    assert o.shape == (B, F)
    weights = jnp.reshape(weights, (1, F))

    itemsize = jnp.dtype(s.dtype).itemsize
    sub = max(8, 32 // itemsize)            # sublane multiple: 8 f32, 16 bf16, 32 int8

    # ---- generation-aware VMEM budget (v5e/v6e: 128 MiB, v7x: 64 MiB physical) ----
    try:
        vmem_cap = pltpu.get_tpu_info().vmem_capacity_bytes
    except Exception:  # conservative fallback
        vmem_cap = 64 * 1024 * 1024
    vmem_limit = max(32 * 1024 * 1024, min((vmem_cap * 3) // 4, 100 * 1024 * 1024))

    # ---- row tile (parallel axis; make it 2-TC friendly on v7x for moderate B) ----
    Bp = _round_up(B, sub)
    if tb is None:
        n_b = pl.cdiv(Bp, 512)
        if n_b == 1 and Bp >= 256:
            n_b = 2                          # give both v7x TensorCores an i-step
        tb = _round_up(pl.cdiv(Bp, n_b), sub)
    else:
        tb = _round_up(tb, sub)
    n_b = pl.cdiv(B, tb)

    # ---- feature tile: byte-capped, 128-aligned; NO wrapper-side padding of s/o ----
    Fp128 = _round_up(F, 128)
    if tf is None:
        # 2 inputs x up to 3 pipeline buffers x tile  <=  ~half the VMEM limit
        tile_cap = max(vmem_limit // 12, tb * 128 * itemsize)
        cap_cols = max(128, ((tile_cap // (tb * itemsize)) // 128) * 128)
        tf = min(cap_cols, Fp128)
        # Prefer a tf that exactly tiles the 128-rounded feature dim (avoids a
        # partial last feature block), as long as it stays reasonably large.
        n128 = Fp128 // 128
        for d in range(min(cap_cols // 128, n128), 0, -1):
            if n128 % d == 0:
                if d * 128 >= tf // 2:
                    tf = d * 128
                break
    else:
        tf = _round_up(tf, 128)
    n_k = pl.cdiv(F, tf)
    ragged = (n_k * tf != F)                 # feature tail needs in-kernel masking

    kernel = functools.partial(_dismult_kernel, tf=tf, feat=F, ragged=ragged)

    def _io_spec():
        if n_k >= 3:
            try:
                return pl.BlockSpec((tb, tf), lambda i, k: (i, k),
                                    pipeline_mode=pl.Buffered(3))
            except TypeError:                # older BlockSpec without pipeline_mode
                pass
        return pl.BlockSpec((tb, tf), lambda i, k: (i, k))

    out = pl.pallas_call(
        kernel,
        out_shape=jax.ShapeDtypeStruct((B, 1), jnp.float32),
        grid_spec=pltpu.PrefetchScalarGridSpec(
            num_scalar_prefetch=0,
            grid=(n_b, n_k),                                      # reduction axis last
            in_specs=[
                _io_spec(),                                       # s
                pl.BlockSpec((1, tf), lambda i, k: (0, k)),       # weights (tiny per-step DMA)
                _io_spec(),                                       # o
            ],
            out_specs=pl.BlockSpec((tb, 1), lambda i, k: (i, 0)),
            scratch_shapes=[pltpu.VMEM((tb, 128), jnp.float32)],  # lane-wise partials
        ),
        compiler_params=pltpu.CompilerParams(
            dimension_semantics=("parallel", "arbitrary"),
            vmem_limit_bytes=vmem_limit,
        ),
    )(s, weights, o)
    return out[:, 0]


if __name__ == "__main__":
    feat_num = 500      # module default (500 < 512 -> exercises the ragged-F mask path)
    batch = 8

    key = jax.random.PRNGKey(0)
    k_w, k_s, k_o = jax.random.split(key, 3)

    # Deterministic parameter init, matching nn.init.normal_(weights, 0, 1)
    weights = jax.random.normal(k_w, (1, feat_num), dtype=jnp.float32)
    s = jax.random.normal(k_s, (batch, feat_num), dtype=jnp.float32)
    o = jax.random.normal(k_o, (batch, feat_num), dtype=jnp.float32)

    out = jax.block_until_ready(single_relation_dismult(s, weights, o))
    ref = jnp.sum(s * weights * o, axis=1)
    assert out.shape == (batch,)
    assert out.dtype == jnp.float32
    assert jnp.allclose(out, ref, atol=1e-4, rtol=1e-4)

    # Ragged-batch path (partial last row block, no wrapper-side padding).
    s2, o2 = s[:5], o[:5]
    out2 = jax.block_until_ready(single_relation_dismult(s2, weights, o2))
    ref2 = jnp.sum(s2 * weights * o2, axis=1)
    assert out2.shape == (5,)
    assert jnp.allclose(out2, ref2, atol=1e-4, rtol=1e-4)

    print("KERNEL_OK")
</pallas_src>

<mosaic_0001>
module attributes {stable_mosaic.version = 11 : i64} {
  func.func @_dismult_kernel(%arg0: i32, %arg1: i32, %arg2: memref<8x512xf32, #tpu.memory_space<vmem>>, %arg3: memref<1x512xf32, #tpu.memory_space<vmem>>, %arg4: memref<8x512xf32, #tpu.memory_space<vmem>>, %arg5: memref<8x1xf32, #tpu.memory_space<vmem>>, %arg6: memref<8x128xf32, #tpu.memory_space<vmem>>) attributes {dimension_semantics = [#tpu.dimension_semantics<parallel>, #tpu.dimension_semantics<arbitrary>], iteration_bounds = array<i64: 1, 1>, scalar_prefetch = 0 : i64, scratch_operands = 1 : i64, tpu.core_type = #tpu.core_type<tc>, window_params = [{transform_indices = @transform_0, window_bounds = array<i64: 8, 512>}, {transform_indices = @transform_1, window_bounds = array<i64: 1, 512>}, {transform_indices = @transform_2, window_bounds = array<i64: 8, 512>}, {transform_indices = @transform_3, window_bounds = array<i64: 8, 1>}]} {
    %c0_i32 = arith.constant 0 : i32
    %0 = arith.cmpi eq, %arg1, %c0_i32 : i32
    %1 = arith.extui %0 : i1 to i32
    %c0_i32_0 = arith.constant 0 : i32
    %2 = arith.cmpi ne, %1, %c0_i32_0 : i32
    scf.if %2 {
      %cst_37 = arith.constant 0.000000e+00 : f32
      %72 = vector.broadcast %cst_37 : f32 to vector<8x128xf32>
      %c0_38 = arith.constant 0 : index
      %c0_39 = arith.constant 0 : index
      %73 = vector.load %arg6[%c0_38, %c0_39] : memref<8x128xf32, #tpu.memory_space<vmem>>, vector<8x128xf32>
      tpu.vector_store %arg6[%c0_38, %c0_39], %72 {strides = array<i32>} : memref<8x128xf32, #tpu.memory_space<vmem>>, vector<8x128xf32>,
    } else {
    }
    %c0 = arith.constant 0 : index
    %c0_1 = arith.constant 0 : index
    %3 = vector.load %arg6[%c0, %c0_1] : memref<8x128xf32, #tpu.memory_space<vmem>>, vector<8x128xf32>
    %c0_2 = arith.constant 0 : index
    %c0_3 = arith.constant 0 : index
    %4 = vector.load %arg2[%c0_2, %c0_3] : memref<8x512xf32, #tpu.memory_space<vmem>>, vector<8x128xf32>
    %c0_4 = arith.constant 0 : index
    %c0_5 = arith.constant 0 : index
    %5 = vector.load %arg4[%c0_4, %c0_5] : memref<8x512xf32, #tpu.memory_space<vmem>>, vector<8x128xf32>
    %c0_6 = arith.constant 0 : index
    %c0_7 = arith.constant 0 : index
    %6 = vector.load %arg3[%c0_6, %c0_7] : memref<1x512xf32, #tpu.memory_space<vmem>>, vector<1x128xf32>
    %7 = vector.broadcast %6 : vector<1x128xf32> to vector<8x128xf32>
    %8 = arith.mulf %4, %7 : vector<8x128xf32>
    %9 = arith.mulf %8, %5 : vector<8x128xf32>
    %c512_i32 = arith.constant 512 : i32
    %10 = arith.muli %arg1, %c512_i32 : i32
    %c0_i32_8 = arith.constant 0 : i32
    %11 = arith.addi %10, %c0_i32_8 : i32
    %12 = tpu.iota {dimensions = array<i32: 1>} : vector<8x128xi32>
    %13 = vector.broadcast %11 : i32 to vector<8x128xi32>
    %14 = arith.addi %13, %12 : vector<8x128xi32>
    %c500_i32 = arith.constant 500 : i32
    %15 = vector.broadcast %c500_i32 : i32 to vector<8x128xi32>
    %16 = arith.cmpi slt, %14, %15 : vector<8x128xi32>
    %cst = arith.constant 0.000000e+00 : f32
    %17 = vector.broadcast %cst : f32 to vector<8x128xf32>
    %18 = arith.select %16, %9, %17 : vector<8x128xi1>, vector<8x128xf32>
    %19 = arith.addf %3, %18 : vector<8x128xf32>
    %c0_9 = arith.constant 0 : index
    %c128 = arith.constant 128 : index
    %20 = vector.load %arg2[%c0_9, %c128] : memref<8x512xf32, #tpu.memory_space<vmem>>, vector<8x128xf32>
    %c0_10 = arith.constant 0 : index
    %c128_11 = arith.constant 128 : index
    %21 = vector.load %arg4[%c0_10, %c128_11] : memref<8x512xf32, #tpu.memory_space<vmem>>, vector<8x128xf32>
    %c0_12 = arith.constant 0 : index
    %c128_13 = arith.constant 128 : index
    %22 = vector.load %arg3[%c0_12, %c128_13] : memref<1x512xf32, #tpu.memory_space<vmem>>, vector<1x128xf32>
    %23 = vector.broadcast %22 : vector<1x128xf32> to vector<8x128xf32>
    %24 = arith.mulf %20, %23 : vector<8x128xf32>
    %25 = arith.mulf %24, %21 : vector<8x128xf32>
    %c512_i32_14 = arith.constant 512 : i32
    %26 = arith.muli %arg1, %c512_i32_14 : i32
    %c128_i32 = arith.constant 128 : i32
    %27 = arith.addi %26, %c128_i32 : i32
    %28 = tpu.iota {dimensions = array<i32: 1>} : vector<8x128xi32>
    %29 = vector.broadcast %27 : i32 to vector<8x128xi32>
    %30 = arith.addi %29, %28 : vector<8x128xi32>
    %c500_i32_15 = arith.constant 500 : i32
    %31 = vector.broadcast %c500_i32_15 : i32 to vector<8x128xi32>
    %32 = arith.cmpi slt, %30, %31 : vector<8x128xi32>
    %cst_16 = arith.constant 0.000000e+00 : f32
    %33 = vector.broadcast %cst_16 : f32 to vector<8x128xf32>
    %34 = arith.select %32, %25, %33 : vector<8x128xi1>, vector<8x128xf32>
    %35 = arith.addf %19, %34 : vector<8x128xf32>
    %c0_17 = arith.constant 0 : index
    %c256 = arith.constant 256 : index
    %36 = vector.load %arg2[%c0_17, %c256] : memref<8x512xf32, #tpu.memory_space<vmem>>, vector<8x128xf32>
    %c0_18 = arith.constant 0 : index
    %c256_19 = arith.constant 256 : index
    %37 = vector.load %arg4[%c0_18, %c256_19] : memref<8x512xf32, #tpu.memory_space<vmem>>, vector<8x128xf32>
    %c0_20 = arith.constant 0 : index
    %c256_21 = arith.constant 256 : index
    %38 = vector.load %arg3[%c0_20, %c256_21] : memref<1x512xf32, #tpu.memory_space<vmem>>, vector<1x128xf32>
    %39 = vector.broadcast %38 : vector<1x128xf32> to vector<8x128xf32>
    %40 = arith.mulf %36, %39 : vector<8x128xf32>
    %41 = arith.mulf %40, %37 : vector<8x128xf32>
    %c512_i32_22 = arith.constant 512 : i32
    %42 = arith.muli %arg1, %c512_i32_22 : i32
    %c256_i32 = arith.constant 256 : i32
    %43 = arith.addi %42, %c256_i32 : i32
    %44 = tpu.iota {dimensions = array<i32: 1>} : vector<8x128xi32>
    %45 = vector.broadcast %43 : i32 to vector<8x128xi32>
    %46 = arith.addi %45, %44 : vector<8x128xi32>
    %c500_i32_23 = arith.constant 500 : i32
    %47 = vector.broadcast %c500_i32_23 : i32 to vector<8x128xi32>
    %48 = arith.cmpi slt, %46, %47 : vector<8x128xi32>
    %cst_24 = arith.constant 0.000000e+00 : f32
    %49 = vector.broadcast %cst_24 : f32 to vector<8x128xf32>
    %50 = arith.select %48, %41, %49 : vector<8x128xi1>, vector<8x128xf32>
    %51 = arith.addf %35, %50 : vector<8x128xf32>
    %c0_25 = arith.constant 0 : index
    %c384 = arith.constant 384 : index
    %52 = vector.load %arg2[%c0_25, %c384] : memref<8x512xf32, #tpu.memory_space<vmem>>, vector<8x128xf32>
    %c0_26 = arith.constant 0 : index
    %c384_27 = arith.constant 384 : index
    %53 = vector.load %arg4[%c0_26, %c384_27] : memref<8x512xf32, #tpu.memory_space<vmem>>, vector<8x128xf32>
    %c0_28 = arith.constant 0 : index
    %c384_29 = arith.constant 384 : index
    %54 = vector.load %arg3[%c0_28, %c384_29] : memref<1x512xf32, #tpu.memory_space<vmem>>, vector<1x128xf32>
    %55 = vector.broadcast %54 : vector<1x128xf32> to vector<8x128xf32>
    %56 = arith.mulf %52, %55 : vector<8x128xf32>
    %57 = arith.mulf %56, %53 : vector<8x128xf32>
    %c512_i32_30 = arith.constant 512 : i32
    %58 = arith.muli %arg1, %c512_i32_30 : i32
    %c384_i32 = arith.constant 384 : i32
    %59 = arith.addi %58, %c384_i32 : i32
    %60 = tpu.iota {dimensions = array<i32: 1>} : vector<8x128xi32>
    %61 = vector.broadcast %59 : i32 to vector<8x128xi32>
    %62 = arith.addi %61, %60 : vector<8x128xi32>
    %c500_i32_31 = arith.constant 500 : i32
    %63 = vector.broadcast %c500_i32_31 : i32 to vector<8x128xi32>
    %64 = arith.cmpi slt, %62, %63 : vector<8x128xi32>
    %cst_32 = arith.constant 0.000000e+00 : f32
    %65 = vector.broadcast %cst_32 : f32 to vector<8x128xf32>
    %66 = arith.select %64, %57, %65 : vector<8x128xi1>, vector<8x128xf32>
    %67 = arith.addf %51, %66 : vector<8x128xf32>
    %c0_33 = arith.constant 0 : index
    %c0_34 = arith.constant 0 : index
    %68 = vector.load %arg6[%c0_33, %c0_34] : memref<8x128xf32, #tpu.memory_space<vmem>>, vector<8x128xf32>
    tpu.vector_store %arg6[%c0_33, %c0_34], %67 {strides = array<i32>} : memref<8x128xf32, #tpu.memory_space<vmem>>, vector<8x128xf32>,
    %c0_i32_35 = arith.constant 0 : i32
    %69 = arith.cmpi eq, %arg1, %c0_i32_35 : i32
    %70 = arith.extui %69 : i1 to i32
    %c0_i32_36 = arith.constant 0 : i32
    %71 = arith.cmpi ne, %70, %c0_i32_36 : i32
    scf.if %71 {
      %c0_37 = arith.constant 0 : index
      %c0_38 = arith.constant 0 : index
      %72 = vector.load %arg6[%c0_37, %c0_38] : memref<8x128xf32, #tpu.memory_space<vmem>>, vector<8x128xf32>
      %cst_39 = arith.constant dense<0.000000e+00> : vector<8xf32>
      %73 = vector.multi_reduction <add>, %72, %cst_39 [1] : vector<8x128xf32> to vector<8xf32>
      %74 = vector.shape_cast %73 : vector<8xf32> to vector<8x1xf32>
      %c0_40 = arith.constant 0 : index
      %c0_41 = arith.constant 0 : index
      %75 = vector.load %arg5[%c0_40, %c0_41] : memref<8x1xf32, #tpu.memory_space<vmem>>, vector<8x1xf32>
      tpu.vector_store %arg5[%c0_40, %c0_41], %74 {strides = array<i32>} : memref<8x1xf32, #tpu.memory_space<vmem>>, vector<8x1xf32>,
    } else {
    }
    return
  }
  func.func @transform_0(%arg0: i32, %arg1: i32) -> (i32, i32) {
    %c0_i32 = arith.constant 0 : i32
    return %arg0, %arg1 : i32, i32
  }
  func.func @transform_1(%arg0: i32, %arg1: i32) -> (i32, i32) {
    %c0_i32 = arith.constant 0 : i32
    %c0_i32_0 = arith.constant 0 : i32
    return %c0_i32, %arg1 : i32, i32
  }
  func.func @transform_2(%arg0: i32, %arg1: i32) -> (i32, i32) {
    %c0_i32 = arith.constant 0 : i32
    return %arg0, %arg1 : i32, i32
  }
  func.func @transform_3(%arg0: i32, %arg1: i32) -> (i32, i32) {
    %c0_i32 = arith.constant 0 : i32
    %c0_i32_0 = arith.constant 0 : i32
    return %arg0, %c0_i32 : i32, i32
  }
}

</mosaic_0001>

<bundles_post_ra>
// kernel: tpu_custom_call.1
= control target key start
LH: loop header
LB: loop body
LE: loop exit
PB: predicated region body
PF: predicated region fallthrough
CT: control target
= control target key end

     0   :  { %8 = vsyncpa [#allocation4], 0  ;;  %s246_s0 = inlined_call_operand.hbm [shape: f32[8,500], index: 0, kind: input, shape index: {}]   ;;  %s247_s1 = inlined_call_operand.hbm [shape: f32[1,500], index: 1, kind: input, shape index: {}]   ;;  %s248_s2 = inlined_call_operand.hbm [shape: f32[8,500], index: 2, kind: input, shape index: {}]   ;;  %s249_s3 = inlined_call_operand.vmem [shape: f32[8,1], index: 3, kind: output, shape index: {}]  }
   0x1   :  { %9 = vsyncpa [#allocation6], 0  ;;  %s211_s12 = smov [#allocation5]   ;;  %s212_s14 = smov [#allocation3]  }
   0x2   :  { %s26_s13 = sshll.u32 %s211_s12, 4  ;;  %s16_s15 = sshll.u32 %s212_s14, 4  ;;  %s27_s13 = int_to_ptr.vmem [resolvable:$true] %s26_s13  ;;  %s17_s15 = int_to_ptr.vmem [resolvable:$true] %s16_s15 }
   0x3   :  { %s155_s16 = scalar_lea.vmem %s27_s13, 64  ;;  %p160_p1 = scmp.lt.s32.totalorder %s27_s13, %s27_s13 }
   0x4   :  { %p156_p0 = scmp.ne.s32.totalorder %s27_s13, %s155_s16  ;;  %p161_p2 = scmp.lt.s32.totalorder %s155_s16, %s155_s16 }
   0x6   :  { %p162_p3 = por %p161_p2, %p160_p1 }
   0x8   :  { %p163_p4 = pnand %p162_p3, %p156_p0 }
   0xa   :  { %166 = shalt.err (!%p163_p4)
}
   0xb   :  { %29 = dma.hbm_to_vmem [thread:$0]  %s247_s1, 64, %s27_s13, [#allocation6]  }
   0xc   :  { %s175_s19 = scalar_lea.vmem %s17_s15, 512  ;;  %p180_p6 = scmp.lt.s32.totalorder %s17_s15, %s17_s15 }
   0xd   :  { %p176_p5 = scmp.ne.s32.totalorder %s17_s15, %s175_s19  ;;  %p181_p7 = scmp.lt.s32.totalorder %s175_s19, %s175_s19 }
   0xf   :  { %p182_p8 = por %p181_p7, %p180_p6 }
  0x11   :  { %p183_p9 = pnand %p182_p8, %p176_p5 }
  0x13   :  { %186 = shalt.err (!%p183_p9)
}
  0x14   :  { %19 = dma.hbm_to_vmem [thread:$0]  %s246_s0, 512, %s17_s15, [#allocation4]  }
  0x15   :  { %s213_s22 = smov [#allocation7]  }
  0x16   :  { %s36_s23 = sshll.u32 %s213_s22, 4  ;;  %s37_s23 = int_to_ptr.vmem [resolvable:$true] %s36_s23 }
  0x17   :  { %s195_s24 = scalar_lea.vmem %s37_s23, 512  ;;  %p200_p11 = scmp.lt.s32.totalorder %s37_s23, %s37_s23 }
  0x18   :  { %p196_p10 = scmp.ne.s32.totalorder %s37_s23, %s195_s24  ;;  %p201_p12 = scmp.lt.s32.totalorder %s195_s24, %s195_s24 }
  0x1a   :  { %p202_p13 = por %p201_p12, %p200_p11 }
  0x1c   :  { %p203_p0 = pnand %p202_p13, %p196_p10 }
  0x1e   :  { %206 = shalt.err (!%p203_p0)
}
  0x1f   :  { %39 = dma.hbm_to_vmem [thread:$0]  %s248_s2, 512, %s37_s23, [#allocation6]  }
  0x20   :  { %207 = dma.done.wait [#allocation4], 512  }
  0x21   :  { %208 = vsyncadd [#allocation4], 4294966784 }
  0x22   :  { %209 = dma.done.wait [#allocation6], 576  }
  0x23   :  { %210 = vsyncadd [#allocation6], 4294966720  ;;  %v67_v0 = vlaneseq  ;;  %v55_v2 = vld [vmem:[#allocation3] sm:$0xff]  ;;  %v74_v6 = vld [vmem:[#allocation3 + $0x8] sm:$0xff]  ;;  %vm132_vm1 = vcmask 7168  }
  0x24   :  { %v56_v3 = vld [vmem:[#allocation7] sm:$0xff]  ;;  %v140_v4 = vld [vmem:[#allocation5] ss:$0 sm:$0xff]  ;;  %v75_v7 = vld [vmem:[#allocation7 + $0x8] sm:$0xff] }
  0x25   :  { %v68_v1 = vand.u32 127, %v67_v0  ;;  %v64_v5 = vmul.f32 %v140_v4, %v55_v2  ;;  %v141_v8 = vld [vmem:[#allocation5 + $0x1] ss:$0 sm:$0xff]  ;;  %v91_v11 = vld [vmem:[#allocation3 + $0x10] sm:$0xff]  ;;  %v142_v13 = vld [vmem:[#allocation5 + $0x2] ss:$0 sm:$0xff] }
  0x26   :  { %v83_v10 = vmul.f32 %v141_v8, %v74_v6  ;;  %v92_v12 = vld [vmem:[#allocation7 + $0x10] sm:$0xff]  ;;  %v100_v15 = vmul.f32 %v142_v13, %v91_v11  ;;  %v109_v17 = vld [vmem:[#allocation7 + $0x18] sm:$0xff] }
  0x27   :  { %v121_v9 = vadd.s32 384, %v68_v1  ;;  %v65_v14 = vmul.f32 %v64_v5, %v56_v3  ;;  %v108_v16 = vld [vmem:[#allocation3 + $0x18] sm:$0xff]  ;;  %v143_v18 = vld [vmem:[#allocation5 + $0x3] ss:$0 sm:$0xff] }
  0x28   :  { %v84_v19 = vmul.f32 %v83_v10, %v75_v7  ;;  %v117_v20 = vmul.f32 %v143_v18, %v108_v16  ;;  %v101_v21 = vmul.f32 %v100_v15, %v92_v12 }
  0x29   :  { %vm122_vm0 = vcmp.lt.s32.totalorder %v121_v9, 500 }
  0x2a   :  { %v90_v22 = vadd.f32 %v84_v19, %v65_v14  ;;  %v118_v23 = vmul.f32 %v117_v20, %v109_v17 }
  0x2c   :  { %v107_v24 = vadd.f32 %v101_v21, %v90_v22  ;;  %v123_v25 = vsel %vm122_vm0, %v118_v23, 0.0 }
  0x2e   :  { %v124_v26 = vadd.f32 %v123_v25, %v107_v24 }
  0x30   :  { %130 = vadd.xlane.f32.xlu0 %v124_v26 }
  0xb9   :  { %v131_v27 = vpop.xlane.xlu0 %130 }
  0xba   :  { %133 = vst.msk [vmem:[%s249_s3] sm:$0xff] %vm132_vm1, %v131_v27 }
  0xbb   :  { %138 = vsyncpa [#allocation4], 1 }
  0xbc   :  { %139 = vsyncpa [#allocation6], 1 }

</bundles_post_ra>
